<compile_context>
chip_gen: v7x
topology: tpu7x:2x2x1
jax: 0.10.0
libtpu: 0.0.40
codegen_flags: <defaults>
</compile_context>

<pallas_src>
import functools
import math

import jax
import jax.numpy as jnp
from jax import lax
from jax.experimental import pallas as pl
from jax.experimental.pallas import tpu as pltpu


def _round_up(x, m):
    return ((x + m - 1) // m) * m


def _embed_gather_kernel(ids_ref, emb_hbm_ref, out_ref, rows_vmem, copy_sems,
                         *, scale, tokens_per_step):
    """Double-buffered embedding-row gather + scale.

    ids_ref     : (n_padded,) int32 token ids, scalar-prefetched into SMEM.
    emb_hbm_ref : (V, D) embedding table, left in HBM (memory_space=pl.ANY).
    out_ref     : (T, D) output block for this grid step (pipelined VMEM).
    rows_vmem   : (2, T, D) VMEM scratch -- two gather slots (double buffer).
    copy_sems   : (2,) DMA semaphores, ONE per slot (shared by its T copies).
    """
    T = tokens_per_step
    step = pl.program_id(0)
    n_steps = pl.num_programs(0)
    slot = lax.rem(step, 2)

    def issue_gather(block_idx, slot_idx):
        base = block_idx * T

        def issue_one(t):
            row = ids_ref[base + t]
            pltpu.make_async_copy(
                emb_hbm_ref.at[pl.ds(row, 1), :],
                rows_vmem.at[slot_idx, pl.ds(t, 1), :],
                copy_sems.at[slot_idx],
            ).start()

        if T <= 32:
            # Small blocks: fully unrolled issue (cheap trace, max overlap).
            for t in range(T):
                issue_one(t)
        else:
            # Larger blocks: rolled loop with moderate unroll so the scalar
            # slot pipelines SMEM id reads with descriptor construction.
            def body(t, carry):
                issue_one(t)
                return carry
            lax.fori_loop(0, T, body, 0, unroll=8)

    # Prime the pipeline: step 0 has nothing in flight yet.
    @pl.when(step == 0)
    def _():
        issue_gather(0, 0)

    # Cross-step prefetch: start the NEXT block's gather into the other slot
    # before waiting on ours, so its HBM latency is hidden.
    @pl.when(step + 1 < n_steps)
    def _():
        issue_gather(step + 1, 1 - slot)

    # Aggregate wait: DMA semaphores count bytes, so one descriptor covering
    # the full (T, D) slot retires all T row copies that signaled it.
    pltpu.make_async_copy(
        rows_vmem.at[slot], rows_vmem.at[slot], copy_sems.at[slot]
    ).wait()

    # One dense (T, D) store; sqrt(d_model) scaling done in f32 on the VPU.
    out_ref[...] = (rows_vmem[slot].astype(jnp.float32) * scale).astype(
        out_ref.dtype)


def input_embeddings(token_ids, emb_table, tokens_per_step=128):
    """token_ids: (B, S) int ids, emb_table: (V, D) -> (B, S, D) in table dtype.

    tokens_per_step (T): tokens gathered per grid step. It is clamped to a
    sublane multiple (8 for f32, 16 for bf16) and to the (rounded-up) token
    count; 128-256 is a good range for realistic B*S and D. Inputs whose
    token count is not a multiple of T are padded with id 0 and the padded
    rows are sliced off afterwards (one extra output copy in that case).
    """
    B, S = token_ids.shape
    V, D = emb_table.shape
    dtype = emb_table.dtype
    scale = math.sqrt(float(D))

    itemsize = jnp.dtype(dtype).itemsize
    sublane = {4: 8, 2: 16, 1: 32}.get(itemsize, 8)

    flat_ids = token_ids.reshape(-1).astype(jnp.int32)
    n_tok = flat_ids.shape[0]

    # Don't over-pad tiny inputs; keep T a sublane multiple.
    T = min(int(tokens_per_step), _round_up(n_tok, sublane))
    T = max(sublane, _round_up(T, sublane))

    n_pad = (-n_tok) % T
    if n_pad:
        # Pad with a valid id (0); padded rows are dropped below.
        flat_ids = jnp.concatenate(
            [flat_ids, jnp.zeros((n_pad,), dtype=jnp.int32)])
    n_padded = n_tok + n_pad
    n_steps = n_padded // T

    out_flat = pl.pallas_call(
        functools.partial(_embed_gather_kernel, scale=scale,
                          tokens_per_step=T),
        out_shape=jax.ShapeDtypeStruct((n_padded, D), dtype),
        grid_spec=pltpu.PrefetchScalarGridSpec(
            num_scalar_prefetch=1,
            grid=(n_steps,),
            in_specs=[
                # Table stays in HBM; rows are DMA-gathered manually.
                pl.BlockSpec(memory_space=pl.ANY),
            ],
            # Dense (T, D) output block: full-sublane, unmasked vector stores.
            out_specs=pl.BlockSpec((T, D), lambda i, ids: (i, 0)),
            scratch_shapes=[
                pltpu.VMEM((2, T, D), dtype),          # double-buffered rows
                pltpu.SemaphoreType.DMA((2,)),         # one DMA sem per slot
            ],
        ),
        compiler_params=pltpu.CompilerParams(
            # Sequential grid required by the prime-at-step-0 double buffer.
            dimension_semantics=("arbitrary",)),
    )(flat_ids, emb_table)

    if n_pad:
        out_flat = out_flat[:n_tok]
    return out_flat.reshape(B, S, D)


if __name__ == "__main__":
    # Module hyperparameters (small, deterministic).
    d_model = 128
    vocab_size = 512
    batch, seq = 2, 8

    key = jax.random.PRNGKey(0)
    k_emb, k_ids, k_ids2 = jax.random.split(key, 3)

    # nn.Embedding weight ~ N(0, 1); deterministic init in-script.
    emb_table = jax.random.normal(k_emb, (vocab_size, d_model),
                                  dtype=jnp.float32)
    token_ids = jax.random.randint(k_ids, (batch, seq), 0, vocab_size,
                                   dtype=jnp.int32)
    sqrt_d = math.sqrt(float(d_model))

    # 1) Main check: T=8 -> 2 grid steps (prime + cross-step prefetch + tail).
    out = input_embeddings(token_ids, emb_table, tokens_per_step=8)
    out = jax.block_until_ready(out)
    ref = jnp.take(emb_table, token_ids, axis=0) * sqrt_d
    assert out.shape == (batch, seq, d_model)
    assert out.dtype == jnp.float32
    assert bool(jnp.allclose(out, ref, atol=1e-6, rtol=1e-6))

    # 2) Padding path: token count (10) not a multiple of T (8).
    token_ids_tail = token_ids[:, : seq - 3]
    out_tail = jax.block_until_ready(
        input_embeddings(token_ids_tail, emb_table, tokens_per_step=8))
    ref_tail = jnp.take(emb_table, token_ids_tail, axis=0) * sqrt_d
    assert bool(jnp.allclose(out_tail, ref_tail, atol=1e-6, rtol=1e-6))

    # 3) Larger block path: T=64 exercises the fori_loop DMA-issue loop.
    token_ids_big = jax.random.randint(k_ids2, (4, 32), 0, vocab_size,
                                       dtype=jnp.int32)
    out_big = jax.block_until_ready(
        input_embeddings(token_ids_big, emb_table, tokens_per_step=64))
    ref_big = jnp.take(emb_table, token_ids_big, axis=0) * sqrt_d
    assert bool(jnp.allclose(out_big, ref_big, atol=1e-6, rtol=1e-6))

    print("KERNEL_OK")
</pallas_src>

<mosaic_0001>
module attributes {stable_mosaic.version = 11 : i64} {
  func.func @_embed_gather_kernel(%arg0: i32, %arg1: memref<16xi32, #tpu.memory_space<smem>>, %arg2: memref<512x128xf32, #tpu.memory_space<any>>, %arg3: memref<8x128xf32, #tpu.memory_space<vmem>>, %arg4: memref<2x8x128xf32, #tpu.memory_space<vmem>>, %arg5: memref<2x!tpu.dma_semaphore, #tpu.memory_space<semaphore_mem>>) attributes {dimension_semantics = [#tpu.dimension_semantics<arbitrary>], iteration_bounds = array<i64: 2>, scalar_prefetch = 1 : i64, scratch_operands = 2 : i64, tpu.core_type = #tpu.core_type<tc>, window_params = [{}, {transform_indices = @transform_1, window_bounds = array<i64: 8, 128>}]} {
    %c2_i32 = arith.constant 2 : i32
    %0 = arith.remsi %arg0, %c2_i32 : i32
    %c0_i32 = arith.constant 0 : i32
    %1 = arith.cmpi eq, %arg0, %c0_i32 : i32
    %2 = arith.extui %1 : i1 to i32
    %c0_i32_0 = arith.constant 0 : i32
    %3 = arith.cmpi ne, %2, %c0_i32_0 : i32
    scf.if %3 {
      %c0_10 = arith.constant 0 : index
      %20 = memref.load %arg1[%c0_10] : memref<16xi32, #tpu.memory_space<smem>>
      %c0_i32_11 = arith.constant 0 : i32
      %c0_i32_12 = arith.constant 0 : i32
      %c0_i32_13 = arith.constant 0 : i32
      %21 = tpu.memref_slice %arg2[%20, %c0_i32_13] : memref<512x128xf32, #tpu.memory_space<any>> -> memref<1x128xf32, #tpu.memory_space<any>>
      %c0_i32_14 = arith.constant 0 : i32
      %c0_i32_15 = arith.constant 0 : i32
      %22 = tpu.memref_slice %arg4[%c0_i32_11, %c0_i32_14, %c0_i32_15] : memref<2x8x128xf32, #tpu.memory_space<vmem>> -> memref<1x1x128xf32, #tpu.memory_space<vmem>>
      %23 = tpu.memref_squeeze %22 : memref<1x1x128xf32, #tpu.memory_space<vmem>> -> memref<1x128xf32, #tpu.memory_space<vmem>>
      %24 = tpu.memref_slice %arg5[%c0_i32_12] : memref<2x!tpu.dma_semaphore, #tpu.memory_space<semaphore_mem>> -> memref<1x!tpu.dma_semaphore, #tpu.memory_space<semaphore_mem>>
      %25 = tpu.memref_squeeze %24 : memref<1x!tpu.dma_semaphore, #tpu.memory_space<semaphore_mem>> -> memref<!tpu.dma_semaphore, #tpu.memory_space<semaphore_mem>>
      tpu.enqueue_dma source(%21 : memref<1x128xf32, #tpu.memory_space<any>>) target(%23 : memref<1x128xf32, #tpu.memory_space<vmem>>) target_semaphore(%25 : memref<!tpu.dma_semaphore, #tpu.memory_space<semaphore_mem>>)
      %c1 = arith.constant 1 : index
      %26 = memref.load %arg1[%c1] : memref<16xi32, #tpu.memory_space<smem>>
      %c0_i32_16 = arith.constant 0 : i32
      %c0_i32_17 = arith.constant 0 : i32
      %c0_i32_18 = arith.constant 0 : i32
      %27 = tpu.memref_slice %arg2[%26, %c0_i32_18] : memref<512x128xf32, #tpu.memory_space<any>> -> memref<1x128xf32, #tpu.memory_space<any>>
      %c1_i32_19 = arith.constant 1 : i32
      %c0_i32_20 = arith.constant 0 : i32
      %28 = tpu.memref_slice %arg4[%c0_i32_16, %c1_i32_19, %c0_i32_20] : memref<2x8x128xf32, #tpu.memory_space<vmem>> -> memref<1x1x128xf32, #tpu.memory_space<vmem>>
      %29 = tpu.memref_squeeze %28 : memref<1x1x128xf32, #tpu.memory_space<vmem>> -> memref<1x128xf32, #tpu.memory_space<vmem>>
      %30 = tpu.memref_slice %arg5[%c0_i32_17] : memref<2x!tpu.dma_semaphore, #tpu.memory_space<semaphore_mem>> -> memref<1x!tpu.dma_semaphore, #tpu.memory_space<semaphore_mem>>
      %31 = tpu.memref_squeeze %30 : memref<1x!tpu.dma_semaphore, #tpu.memory_space<semaphore_mem>> -> memref<!tpu.dma_semaphore, #tpu.memory_space<semaphore_mem>>
      tpu.enqueue_dma source(%27 : memref<1x128xf32, #tpu.memory_space<any>>) target(%29 : memref<1x128xf32, #tpu.memory_space<vmem>>) target_semaphore(%31 : memref<!tpu.dma_semaphore, #tpu.memory_space<semaphore_mem>>)
      %c2 = arith.constant 2 : index
      %32 = memref.load %arg1[%c2] : memref<16xi32, #tpu.memory_space<smem>>
      %c0_i32_21 = arith.constant 0 : i32
      %c0_i32_22 = arith.constant 0 : i32
      %c0_i32_23 = arith.constant 0 : i32
      %33 = tpu.memref_slice %arg2[%32, %c0_i32_23] : memref<512x128xf32, #tpu.memory_space<any>> -> memref<1x128xf32, #tpu.memory_space<any>>
      %c2_i32_24 = arith.constant 2 : i32
      %c0_i32_25 = arith.constant 0 : i32
      %34 = tpu.memref_slice %arg4[%c0_i32_21, %c2_i32_24, %c0_i32_25] : memref<2x8x128xf32, #tpu.memory_space<vmem>> -> memref<1x1x128xf32, #tpu.memory_space<vmem>>
      %35 = tpu.memref_squeeze %34 : memref<1x1x128xf32, #tpu.memory_space<vmem>> -> memref<1x128xf32, #tpu.memory_space<vmem>>
      %36 = tpu.memref_slice %arg5[%c0_i32_22] : memref<2x!tpu.dma_semaphore, #tpu.memory_space<semaphore_mem>> -> memref<1x!tpu.dma_semaphore, #tpu.memory_space<semaphore_mem>>
      %37 = tpu.memref_squeeze %36 : memref<1x!tpu.dma_semaphore, #tpu.memory_space<semaphore_mem>> -> memref<!tpu.dma_semaphore, #tpu.memory_space<semaphore_mem>>
      tpu.enqueue_dma source(%33 : memref<1x128xf32, #tpu.memory_space<any>>) target(%35 : memref<1x128xf32, #tpu.memory_space<vmem>>) target_semaphore(%37 : memref<!tpu.dma_semaphore, #tpu.memory_space<semaphore_mem>>)
      %c3 = arith.constant 3 : index
      %38 = memref.load %arg1[%c3] : memref<16xi32, #tpu.memory_space<smem>>
      %c0_i32_26 = arith.constant 0 : i32
      %c0_i32_27 = arith.constant 0 : i32
      %c0_i32_28 = arith.constant 0 : i32
      %39 = tpu.memref_slice %arg2[%38, %c0_i32_28] : memref<512x128xf32, #tpu.memory_space<any>> -> memref<1x128xf32, #tpu.memory_space<any>>
      %c3_i32 = arith.constant 3 : i32
      %c0_i32_29 = arith.constant 0 : i32
      %40 = tpu.memref_slice %arg4[%c0_i32_26, %c3_i32, %c0_i32_29] : memref<2x8x128xf32, #tpu.memory_space<vmem>> -> memref<1x1x128xf32, #tpu.memory_space<vmem>>
      %41 = tpu.memref_squeeze %40 : memref<1x1x128xf32, #tpu.memory_space<vmem>> -> memref<1x128xf32, #tpu.memory_space<vmem>>
      %42 = tpu.memref_slice %arg5[%c0_i32_27] : memref<2x!tpu.dma_semaphore, #tpu.memory_space<semaphore_mem>> -> memref<1x!tpu.dma_semaphore, #tpu.memory_space<semaphore_mem>>
      %43 = tpu.memref_squeeze %42 : memref<1x!tpu.dma_semaphore, #tpu.memory_space<semaphore_mem>> -> memref<!tpu.dma_semaphore, #tpu.memory_space<semaphore_mem>>
      tpu.enqueue_dma source(%39 : memref<1x128xf32, #tpu.memory_space<any>>) target(%41 : memref<1x128xf32, #tpu.memory_space<vmem>>) target_semaphore(%43 : memref<!tpu.dma_semaphore, #tpu.memory_space<semaphore_mem>>)
      %c4 = arith.constant 4 : index
      %44 = memref.load %arg1[%c4] : memref<16xi32, #tpu.memory_space<smem>>
      %c0_i32_30 = arith.constant 0 : i32
      %c0_i32_31 = arith.constant 0 : i32
      %c0_i32_32 = arith.constant 0 : i32
      %45 = tpu.memref_slice %arg2[%44, %c0_i32_32] : memref<512x128xf32, #tpu.memory_space<any>> -> memref<1x128xf32, #tpu.memory_space<any>>
      %c4_i32 = arith.constant 4 : i32
      %c0_i32_33 = arith.constant 0 : i32
      %46 = tpu.memref_slice %arg4[%c0_i32_30, %c4_i32, %c0_i32_33] : memref<2x8x128xf32, #tpu.memory_space<vmem>> -> memref<1x1x128xf32, #tpu.memory_space<vmem>>
      %47 = tpu.memref_squeeze %46 : memref<1x1x128xf32, #tpu.memory_space<vmem>> -> memref<1x128xf32, #tpu.memory_space<vmem>>
      %48 = tpu.memref_slice %arg5[%c0_i32_31] : memref<2x!tpu.dma_semaphore, #tpu.memory_space<semaphore_mem>> -> memref<1x!tpu.dma_semaphore, #tpu.memory_space<semaphore_mem>>
      %49 = tpu.memref_squeeze %48 : memref<1x!tpu.dma_semaphore, #tpu.memory_space<semaphore_mem>> -> memref<!tpu.dma_semaphore, #tpu.memory_space<semaphore_mem>>
      tpu.enqueue_dma source(%45 : memref<1x128xf32, #tpu.memory_space<any>>) target(%47 : memref<1x128xf32, #tpu.memory_space<vmem>>) target_semaphore(%49 : memref<!tpu.dma_semaphore, #tpu.memory_space<semaphore_mem>>)
      %c5 = arith.constant 5 : index
      %50 = memref.load %arg1[%c5] : memref<16xi32, #tpu.memory_space<smem>>
      %c0_i32_34 = arith.constant 0 : i32
      %c0_i32_35 = arith.constant 0 : i32
      %c0_i32_36 = arith.constant 0 : i32
      %51 = tpu.memref_slice %arg2[%50, %c0_i32_36] : memref<512x128xf32, #tpu.memory_space<any>> -> memref<1x128xf32, #tpu.memory_space<any>>
      %c5_i32 = arith.constant 5 : i32
      %c0_i32_37 = arith.constant 0 : i32
      %52 = tpu.memref_slice %arg4[%c0_i32_34, %c5_i32, %c0_i32_37] : memref<2x8x128xf32, #tpu.memory_space<vmem>> -> memref<1x1x128xf32, #tpu.memory_space<vmem>>
      %53 = tpu.memref_squeeze %52 : memref<1x1x128xf32, #tpu.memory_space<vmem>> -> memref<1x128xf32, #tpu.memory_space<vmem>>
      %54 = tpu.memref_slice %arg5[%c0_i32_35] : memref<2x!tpu.dma_semaphore, #tpu.memory_space<semaphore_mem>> -> memref<1x!tpu.dma_semaphore, #tpu.memory_space<semaphore_mem>>
      %55 = tpu.memref_squeeze %54 : memref<1x!tpu.dma_semaphore, #tpu.memory_space<semaphore_mem>> -> memref<!tpu.dma_semaphore, #tpu.memory_space<semaphore_mem>>
      tpu.enqueue_dma source(%51 : memref<1x128xf32, #tpu.memory_space<any>>) target(%53 : memref<1x128xf32, #tpu.memory_space<vmem>>) target_semaphore(%55 : memref<!tpu.dma_semaphore, #tpu.memory_space<semaphore_mem>>)
      %c6 = arith.constant 6 : index
      %56 = memref.load %arg1[%c6] : memref<16xi32, #tpu.memory_space<smem>>
      %c0_i32_38 = arith.constant 0 : i32
      %c0_i32_39 = arith.constant 0 : i32
      %c0_i32_40 = arith.constant 0 : i32
      %57 = tpu.memref_slice %arg2[%56, %c0_i32_40] : memref<512x128xf32, #tpu.memory_space<any>> -> memref<1x128xf32, #tpu.memory_space<any>>
      %c6_i32 = arith.constant 6 : i32
      %c0_i32_41 = arith.constant 0 : i32
      %58 = tpu.memref_slice %arg4[%c0_i32_38, %c6_i32, %c0_i32_41] : memref<2x8x128xf32, #tpu.memory_space<vmem>> -> memref<1x1x128xf32, #tpu.memory_space<vmem>>
      %59 = tpu.memref_squeeze %58 : memref<1x1x128xf32, #tpu.memory_space<vmem>> -> memref<1x128xf32, #tpu.memory_space<vmem>>
      %60 = tpu.memref_slice %arg5[%c0_i32_39] : memref<2x!tpu.dma_semaphore, #tpu.memory_space<semaphore_mem>> -> memref<1x!tpu.dma_semaphore, #tpu.memory_space<semaphore_mem>>
      %61 = tpu.memref_squeeze %60 : memref<1x!tpu.dma_semaphore, #tpu.memory_space<semaphore_mem>> -> memref<!tpu.dma_semaphore, #tpu.memory_space<semaphore_mem>>
      tpu.enqueue_dma source(%57 : memref<1x128xf32, #tpu.memory_space<any>>) target(%59 : memref<1x128xf32, #tpu.memory_space<vmem>>) target_semaphore(%61 : memref<!tpu.dma_semaphore, #tpu.memory_space<semaphore_mem>>)
      %c7 = arith.constant 7 : index
      %62 = memref.load %arg1[%c7] : memref<16xi32, #tpu.memory_space<smem>>
      %c0_i32_42 = arith.constant 0 : i32
      %c0_i32_43 = arith.constant 0 : i32
      %c0_i32_44 = arith.constant 0 : i32
      %63 = tpu.memref_slice %arg2[%62, %c0_i32_44] : memref<512x128xf32, #tpu.memory_space<any>> -> memref<1x128xf32, #tpu.memory_space<any>>
      %c7_i32 = arith.constant 7 : i32
      %c0_i32_45 = arith.constant 0 : i32
      %64 = tpu.memref_slice %arg4[%c0_i32_42, %c7_i32, %c0_i32_45] : memref<2x8x128xf32, #tpu.memory_space<vmem>> -> memref<1x1x128xf32, #tpu.memory_space<vmem>>
      %65 = tpu.memref_squeeze %64 : memref<1x1x128xf32, #tpu.memory_space<vmem>> -> memref<1x128xf32, #tpu.memory_space<vmem>>
      %66 = tpu.memref_slice %arg5[%c0_i32_43] : memref<2x!tpu.dma_semaphore, #tpu.memory_space<semaphore_mem>> -> memref<1x!tpu.dma_semaphore, #tpu.memory_space<semaphore_mem>>
      %67 = tpu.memref_squeeze %66 : memref<1x!tpu.dma_semaphore, #tpu.memory_space<semaphore_mem>> -> memref<!tpu.dma_semaphore, #tpu.memory_space<semaphore_mem>>
      tpu.enqueue_dma source(%63 : memref<1x128xf32, #tpu.memory_space<any>>) target(%65 : memref<1x128xf32, #tpu.memory_space<vmem>>) target_semaphore(%67 : memref<!tpu.dma_semaphore, #tpu.memory_space<semaphore_mem>>)
    } else {
    }
    %c1_i32 = arith.constant 1 : i32
    %4 = arith.addi %arg0, %c1_i32 : i32
    %c2_i32_1 = arith.constant 2 : i32
    %5 = arith.cmpi slt, %4, %c2_i32_1 : i32
    %6 = arith.extui %5 : i1 to i32
    %c0_i32_2 = arith.constant 0 : i32
    %7 = arith.cmpi ne, %6, %c0_i32_2 : i32
    scf.if %7 {
      %c1_i32_10 = arith.constant 1 : i32
      %20 = arith.addi %arg0, %c1_i32_10 : i32
      %c1_i32_11 = arith.constant 1 : i32
      %21 = arith.subi %c1_i32_11, %0 : i32
      %c8_i32 = arith.constant 8 : i32
      %22 = arith.muli %20, %c8_i32 : i32
      %c0_i32_12 = arith.constant 0 : i32
      %23 = arith.addi %22, %c0_i32_12 : i32
      %24 = arith.index_cast %23 : i32 to index
      %25 = memref.load %arg1[%24] : memref<16xi32, #tpu.memory_space<smem>>
      %c0_i32_13 = arith.constant 0 : i32
      %26 = tpu.memref_slice %arg2[%25, %c0_i32_13] : memref<512x128xf32, #tpu.memory_space<any>> -> memref<1x128xf32, #tpu.memory_space<any>>
      %c0_i32_14 = arith.constant 0 : i32
      %c0_i32_15 = arith.constant 0 : i32
      %27 = tpu.memref_slice %arg4[%21, %c0_i32_14, %c0_i32_15] : memref<2x8x128xf32, #tpu.memory_space<vmem>> -> memref<1x1x128xf32, #tpu.memory_space<vmem>>
      %28 = tpu.memref_squeeze %27 : memref<1x1x128xf32, #tpu.memory_space<vmem>> -> memref<1x128xf32, #tpu.memory_space<vmem>>
      %29 = tpu.memref_slice %arg5[%21] : memref<2x!tpu.dma_semaphore, #tpu.memory_space<semaphore_mem>> -> memref<1x!tpu.dma_semaphore, #tpu.memory_space<semaphore_mem>>
      %30 = tpu.memref_squeeze %29 : memref<1x!tpu.dma_semaphore, #tpu.memory_space<semaphore_mem>> -> memref<!tpu.dma_semaphore, #tpu.memory_space<semaphore_mem>>
      tpu.enqueue_dma source(%26 : memref<1x128xf32, #tpu.memory_space<any>>) target(%28 : memref<1x128xf32, #tpu.memory_space<vmem>>) target_semaphore(%30 : memref<!tpu.dma_semaphore, #tpu.memory_space<semaphore_mem>>)
      %c1_i32_16 = arith.constant 1 : i32
      %31 = arith.addi %22, %c1_i32_16 : i32
      %32 = arith.index_cast %31 : i32 to index
      %33 = memref.load %arg1[%32] : memref<16xi32, #tpu.memory_space<smem>>
      %c0_i32_17 = arith.constant 0 : i32
      %34 = tpu.memref_slice %arg2[%33, %c0_i32_17] : memref<512x128xf32, #tpu.memory_space<any>> -> memref<1x128xf32, #tpu.memory_space<any>>
      %c1_i32_18 = arith.constant 1 : i32
      %c0_i32_19 = arith.constant 0 : i32
      %35 = tpu.memref_slice %arg4[%21, %c1_i32_18, %c0_i32_19] : memref<2x8x128xf32, #tpu.memory_space<vmem>> -> memref<1x1x128xf32, #tpu.memory_space<vmem>>
      %36 = tpu.memref_squeeze %35 : memref<1x1x128xf32, #tpu.memory_space<vmem>> -> memref<1x128xf32, #tpu.memory_space<vmem>>
      %37 = tpu.memref_slice %arg5[%21] : memref<2x!tpu.dma_semaphore, #tpu.memory_space<semaphore_mem>> -> memref<1x!tpu.dma_semaphore, #tpu.memory_space<semaphore_mem>>
      %38 = tpu.memref_squeeze %37 : memref<1x!tpu.dma_semaphore, #tpu.memory_space<semaphore_mem>> -> memref<!tpu.dma_semaphore, #tpu.memory_space<semaphore_mem>>
      tpu.enqueue_dma source(%34 : memref<1x128xf32, #tpu.memory_space<any>>) target(%36 : memref<1x128xf32, #tpu.memory_space<vmem>>) target_semaphore(%38 : memref<!tpu.dma_semaphore, #tpu.memory_space<semaphore_mem>>)
      %c2_i32_20 = arith.constant 2 : i32
      %39 = arith.addi %22, %c2_i32_20 : i32
      %40 = arith.index_cast %39 : i32 to index
      %41 = memref.load %arg1[%40] : memref<16xi32, #tpu.memory_space<smem>>
      %c0_i32_21 = arith.constant 0 : i32
      %42 = tpu.memref_slice %arg2[%41, %c0_i32_21] : memref<512x128xf32, #tpu.memory_space<any>> -> memref<1x128xf32, #tpu.memory_space<any>>
      %c2_i32_22 = arith.constant 2 : i32
      %c0_i32_23 = arith.constant 0 : i32
      %43 = tpu.memref_slice %arg4[%21, %c2_i32_22, %c0_i32_23] : memref<2x8x128xf32, #tpu.memory_space<vmem>> -> memref<1x1x128xf32, #tpu.memory_space<vmem>>
      %44 = tpu.memref_squeeze %43 : memref<1x1x128xf32, #tpu.memory_space<vmem>> -> memref<1x128xf32, #tpu.memory_space<vmem>>
      %45 = tpu.memref_slice %arg5[%21] : memref<2x!tpu.dma_semaphore, #tpu.memory_space<semaphore_mem>> -> memref<1x!tpu.dma_semaphore, #tpu.memory_space<semaphore_mem>>
      %46 = tpu.memref_squeeze %45 : memref<1x!tpu.dma_semaphore, #tpu.memory_space<semaphore_mem>> -> memref<!tpu.dma_semaphore, #tpu.memory_space<semaphore_mem>>
      tpu.enqueue_dma source(%42 : memref<1x128xf32, #tpu.memory_space<any>>) target(%44 : memref<1x128xf32, #tpu.memory_space<vmem>>) target_semaphore(%46 : memref<!tpu.dma_semaphore, #tpu.memory_space<semaphore_mem>>)
      %c3_i32 = arith.constant 3 : i32
      %47 = arith.addi %22, %c3_i32 : i32
      %48 = arith.index_cast %47 : i32 to index
      %49 = memref.load %arg1[%48] : memref<16xi32, #tpu.memory_space<smem>>
      %c0_i32_24 = arith.constant 0 : i32
      %50 = tpu.memref_slice %arg2[%49, %c0_i32_24] : memref<512x128xf32, #tpu.memory_space<any>> -> memref<1x128xf32, #tpu.memory_space<any>>
      %c3_i32_25 = arith.constant 3 : i32
      %c0_i32_26 = arith.constant 0 : i32
      %51 = tpu.memref_slice %arg4[%21, %c3_i32_25, %c0_i32_26] : memref<2x8x128xf32, #tpu.memory_space<vmem>> -> memref<1x1x128xf32, #tpu.memory_space<vmem>>
      %52 = tpu.memref_squeeze %51 : memref<1x1x128xf32, #tpu.memory_space<vmem>> -> memref<1x128xf32, #tpu.memory_space<vmem>>
      %53 = tpu.memref_slice %arg5[%21] : memref<2x!tpu.dma_semaphore, #tpu.memory_space<semaphore_mem>> -> memref<1x!tpu.dma_semaphore, #tpu.memory_space<semaphore_mem>>
      %54 = tpu.memref_squeeze %53 : memref<1x!tpu.dma_semaphore, #tpu.memory_space<semaphore_mem>> -> memref<!tpu.dma_semaphore, #tpu.memory_space<semaphore_mem>>
      tpu.enqueue_dma source(%50 : memref<1x128xf32, #tpu.memory_space<any>>) target(%52 : memref<1x128xf32, #tpu.memory_space<vmem>>) target_semaphore(%54 : memref<!tpu.dma_semaphore, #tpu.memory_space<semaphore_mem>>)
      %c4_i32 = arith.constant 4 : i32
      %55 = arith.addi %22, %c4_i32 : i32
      %56 = arith.index_cast %55 : i32 to index
      %57 = memref.load %arg1[%56] : memref<16xi32, #tpu.memory_space<smem>>
      %c0_i32_27 = arith.constant 0 : i32
      %58 = tpu.memref_slice %arg2[%57, %c0_i32_27] : memref<512x128xf32, #tpu.memory_space<any>> -> memref<1x128xf32, #tpu.memory_space<any>>
      %c4_i32_28 = arith.constant 4 : i32
      %c0_i32_29 = arith.constant 0 : i32
      %59 = tpu.memref_slice %arg4[%21, %c4_i32_28, %c0_i32_29] : memref<2x8x128xf32, #tpu.memory_space<vmem>> -> memref<1x1x128xf32, #tpu.memory_space<vmem>>
      %60 = tpu.memref_squeeze %59 : memref<1x1x128xf32, #tpu.memory_space<vmem>> -> memref<1x128xf32, #tpu.memory_space<vmem>>
      %61 = tpu.memref_slice %arg5[%21] : memref<2x!tpu.dma_semaphore, #tpu.memory_space<semaphore_mem>> -> memref<1x!tpu.dma_semaphore, #tpu.memory_space<semaphore_mem>>
      %62 = tpu.memref_squeeze %61 : memref<1x!tpu.dma_semaphore, #tpu.memory_space<semaphore_mem>> -> memref<!tpu.dma_semaphore, #tpu.memory_space<semaphore_mem>>
      tpu.enqueue_dma source(%58 : memref<1x128xf32, #tpu.memory_space<any>>) target(%60 : memref<1x128xf32, #tpu.memory_space<vmem>>) target_semaphore(%62 : memref<!tpu.dma_semaphore, #tpu.memory_space<semaphore_mem>>)
      %c5_i32 = arith.constant 5 : i32
      %63 = arith.addi %22, %c5_i32 : i32
      %64 = arith.index_cast %63 : i32 to index
      %65 = memref.load %arg1[%64] : memref<16xi32, #tpu.memory_space<smem>>
      %c0_i32_30 = arith.constant 0 : i32
      %66 = tpu.memref_slice %arg2[%65, %c0_i32_30] : memref<512x128xf32, #tpu.memory_space<any>> -> memref<1x128xf32, #tpu.memory_space<any>>
      %c5_i32_31 = arith.constant 5 : i32
      %c0_i32_32 = arith.constant 0 : i32
      %67 = tpu.memref_slice %arg4[%21, %c5_i32_31, %c0_i32_32] : memref<2x8x128xf32, #tpu.memory_space<vmem>> -> memref<1x1x128xf32, #tpu.memory_space<vmem>>
      %68 = tpu.memref_squeeze %67 : memref<1x1x128xf32, #tpu.memory_space<vmem>> -> memref<1x128xf32, #tpu.memory_space<vmem>>
      %69 = tpu.memref_slice %arg5[%21] : memref<2x!tpu.dma_semaphore, #tpu.memory_space<semaphore_mem>> -> memref<1x!tpu.dma_semaphore, #tpu.memory_space<semaphore_mem>>
      %70 = tpu.memref_squeeze %69 : memref<1x!tpu.dma_semaphore, #tpu.memory_space<semaphore_mem>> -> memref<!tpu.dma_semaphore, #tpu.memory_space<semaphore_mem>>
      tpu.enqueue_dma source(%66 : memref<1x128xf32, #tpu.memory_space<any>>) target(%68 : memref<1x128xf32, #tpu.memory_space<vmem>>) target_semaphore(%70 : memref<!tpu.dma_semaphore, #tpu.memory_space<semaphore_mem>>)
      %c6_i32 = arith.constant 6 : i32
      %71 = arith.addi %22, %c6_i32 : i32
      %72 = arith.index_cast %71 : i32 to index
      %73 = memref.load %arg1[%72] : memref<16xi32, #tpu.memory_space<smem>>
      %c0_i32_33 = arith.constant 0 : i32
      %74 = tpu.memref_slice %arg2[%73, %c0_i32_33] : memref<512x128xf32, #tpu.memory_space<any>> -> memref<1x128xf32, #tpu.memory_space<any>>
      %c6_i32_34 = arith.constant 6 : i32
      %c0_i32_35 = arith.constant 0 : i32
      %75 = tpu.memref_slice %arg4[%21, %c6_i32_34, %c0_i32_35] : memref<2x8x128xf32, #tpu.memory_space<vmem>> -> memref<1x1x128xf32, #tpu.memory_space<vmem>>
      %76 = tpu.memref_squeeze %75 : memref<1x1x128xf32, #tpu.memory_space<vmem>> -> memref<1x128xf32, #tpu.memory_space<vmem>>
      %77 = tpu.memref_slice %arg5[%21] : memref<2x!tpu.dma_semaphore, #tpu.memory_space<semaphore_mem>> -> memref<1x!tpu.dma_semaphore, #tpu.memory_space<semaphore_mem>>
      %78 = tpu.memref_squeeze %77 : memref<1x!tpu.dma_semaphore, #tpu.memory_space<semaphore_mem>> -> memref<!tpu.dma_semaphore, #tpu.memory_space<semaphore_mem>>
      tpu.enqueue_dma source(%74 : memref<1x128xf32, #tpu.memory_space<any>>) target(%76 : memref<1x128xf32, #tpu.memory_space<vmem>>) target_semaphore(%78 : memref<!tpu.dma_semaphore, #tpu.memory_space<semaphore_mem>>)
      %c7_i32 = arith.constant 7 : i32
      %79 = arith.addi %22, %c7_i32 : i32
      %80 = arith.index_cast %79 : i32 to index
      %81 = memref.load %arg1[%80] : memref<16xi32, #tpu.memory_space<smem>>
      %c0_i32_36 = arith.constant 0 : i32
      %82 = tpu.memref_slice %arg2[%81, %c0_i32_36] : memref<512x128xf32, #tpu.memory_space<any>> -> memref<1x128xf32, #tpu.memory_space<any>>
      %c7_i32_37 = arith.constant 7 : i32
      %c0_i32_38 = arith.constant 0 : i32
      %83 = tpu.memref_slice %arg4[%21, %c7_i32_37, %c0_i32_38] : memref<2x8x128xf32, #tpu.memory_space<vmem>> -> memref<1x1x128xf32, #tpu.memory_space<vmem>>
      %84 = tpu.memref_squeeze %83 : memref<1x1x128xf32, #tpu.memory_space<vmem>> -> memref<1x128xf32, #tpu.memory_space<vmem>>
      %85 = tpu.memref_slice %arg5[%21] : memref<2x!tpu.dma_semaphore, #tpu.memory_space<semaphore_mem>> -> memref<1x!tpu.dma_semaphore, #tpu.memory_space<semaphore_mem>>
      %86 = tpu.memref_squeeze %85 : memref<1x!tpu.dma_semaphore, #tpu.memory_space<semaphore_mem>> -> memref<!tpu.dma_semaphore, #tpu.memory_space<semaphore_mem>>
      tpu.enqueue_dma source(%82 : memref<1x128xf32, #tpu.memory_space<any>>) target(%84 : memref<1x128xf32, #tpu.memory_space<vmem>>) target_semaphore(%86 : memref<!tpu.dma_semaphore, #tpu.memory_space<semaphore_mem>>)
    } else {
    }
    %c0_i32_3 = arith.constant 0 : i32
    %c0_i32_4 = arith.constant 0 : i32
    %8 = tpu.memref_slice %arg4[%0, %c0_i32_3, %c0_i32_4] : memref<2x8x128xf32, #tpu.memory_space<vmem>> -> memref<1x8x128xf32, #tpu.memory_space<vmem>>
    %9 = tpu.memref_squeeze %8 : memref<1x8x128xf32, #tpu.memory_space<vmem>> -> memref<8x128xf32, #tpu.memory_space<vmem>>
    %c0_i32_5 = arith.constant 0 : i32
    %c0_i32_6 = arith.constant 0 : i32
    %10 = tpu.memref_slice %arg4[%0, %c0_i32_5, %c0_i32_6] : memref<2x8x128xf32, #tpu.memory_space<vmem>> -> memref<1x8x128xf32, #tpu.memory_space<vmem>>
    %11 = tpu.memref_squeeze %10 : memref<1x8x128xf32, #tpu.memory_space<vmem>> -> memref<8x128xf32, #tpu.memory_space<vmem>>
    %12 = tpu.memref_slice %arg5[%0] : memref<2x!tpu.dma_semaphore, #tpu.memory_space<semaphore_mem>> -> memref<1x!tpu.dma_semaphore, #tpu.memory_space<semaphore_mem>>
    %13 = tpu.memref_squeeze %12 : memref<1x!tpu.dma_semaphore, #tpu.memory_space<semaphore_mem>> -> memref<!tpu.dma_semaphore, #tpu.memory_space<semaphore_mem>>
    tpu.wait_dma2 semaphore(%13 : memref<!tpu.dma_semaphore, #tpu.memory_space<semaphore_mem>>) src(%9 : memref<8x128xf32, #tpu.memory_space<vmem>>) dst(%11 : memref<8x128xf32, #tpu.memory_space<vmem>>)
    %14 = arith.index_cast %0 : i32 to index
    %c0 = arith.constant 0 : index
    %c0_7 = arith.constant 0 : index
    %15 = vector.load %arg4[%14, %c0, %c0_7] : memref<2x8x128xf32, #tpu.memory_space<vmem>>, vector<1x8x128xf32>
    %16 = vector.shape_cast %15 : vector<1x8x128xf32> to vector<8x128xf32>
    %cst = arith.constant 11.3137083 : f32
    %17 = vector.broadcast %cst : f32 to vector<8x128xf32>
    %18 = arith.mulf %16, %17 : vector<8x128xf32>
    %c0_8 = arith.constant 0 : index
    %c0_9 = arith.constant 0 : index
    %19 = vector.load %arg3[%c0_8, %c0_9] : memref<8x128xf32, #tpu.memory_space<vmem>>, vector<8x128xf32>
    tpu.vector_store %arg3[%c0_8, %c0_9], %18 {strides = array<i32>} : memref<8x128xf32, #tpu.memory_space<vmem>>, vector<8x128xf32>,
    return
  }
  func.func @transform_1(%arg0: i32, %arg1: memref<16xi32, #tpu.memory_space<smem>>) -> (i32, i32) {
    %c0_i32 = arith.constant 0 : i32
    %c0_i32_0 = arith.constant 0 : i32
    return %arg0, %c0_i32 : i32, i32
  }
}

</mosaic_0001>

<bundles_post_ra>
// kernel: tpu_custom_call.1
= control target key start
LH: loop header
LB: loop body
LE: loop exit
PB: predicated region body
PF: predicated region fallthrough
CT: control target
= control target key end

     0   :  { %s1660_s0 = inlined_call_operand.hbm [shape: s32[16], index: 0, kind: input, shape index: {}]   ;;  %s1661_s1 = inlined_call_operand.hbm [shape: f32[512,128], index: 1, kind: input, shape index: {}]   ;;  %s1662_s2 = inlined_call_operand.hbm [shape: f32[16,128], index: 2, kind: output, shape index: {}]  }
   0x1   :  { %s586_s11 = scalar_lea.hbm %s1660_s0, 16 }
   0x2   :  { %p587_p0 = scmp.ne.s32.totalorder %s1660_s0, %s586_s11  ;;  %p590_p1 = scmp.lt.u32.totalorder %s586_s11, %s1660_s0 }
   0x4   :  { %p592_p2 = pnand %p590_p1, %p587_p0 }
   0x6   :  { %595 = shalt.err (!%p592_p2)  }
   0x7   :  { %s1104_s16 = smov [#allocation5]  }
   0x8   :  { %8 = dma.hbm_to_smem %s1660_s0, 16, %s1104_s16, [#allocation4] }
   0x9   :  { %1084 = dma.done.wait [#allocation4], 16 }
   0xa   :  { %1085 = vsyncadd [#allocation4], 4294967280 }
   0xb   :  { %10 = sfence }
   0xc   :  { %11 = vsyncpa [#allocation7], 0 }
   0xd   :  { %13 = vsyncpa [#allocation7 + $0x1], 0  ;;  %s1141_s19 = smov 0   ;;  %s1143_s20 = smov 0  }
   0xe   :  { %s1145_s21 = smov 0  }
   0xf LB: > { %s462_s0 = sadd.s32 4294967295, %s1102_s21   ;;  %s1158_s22 = sadd.s32 1, %s1102_s21   ;;  %s1102_s21 = sphi %s1145_s21, %s1676_s21   ;;  %s1098_s20 = sphi %s1143_s20, %s1675_s20   ;;  %s1094_s19 = sphi %s1141_s19, %s1674_s19  }
  0x10   : > { %s22_s23 = ssub.s32 %s1102_s21, %s1158_s22  ;;  %s25_s24 = sadd.s32 1, %s1098_s20 }
  0x11   : > { %p23_p3 = scmp.eq.s32.totalorder %s22_s23, 0  ;;  %p463_p4 = scmp.ne.s32.totalorder %s22_s23, 0 }
  0x12   : > { %p29_p5 = scmp.eq.s32.totalorder %s1102_s21, 1  ;;  %p34_p6 = scmp.ne.s32.totalorder %s1098_s20, %s1094_s19 }
  0x13   : > { %s1167_s25 = scalar_select %p23_p3, %s1098_s20, %s25_s24  }
  0x14   : > { %p1169_p7 = por %p463_p4, %p29_p5  ;;  %p35_p8 = scmp.eq.s32.totalorder %s462_s0, 1 }
  0x15   : > { %1665 = sst [smem:[#allocation53_spill]] %s1167_s25  ;;  %p464_p10 = scmp.ge.s32.totalorder %s1102_s21, 2 }
  0x16   : > { %s1666_s26 = scalar_select %p1169_p7, 1, 0 }
  0x17   : > { %p1173_p9 = por %p35_p8, %p34_p6  ;;  %44 = sbr.rel (%p464_p10) target bundleno = 460 (0x1cc), region = 12 }
  0x18   : > { %s1664_s28 = sand.u32 (!%p464_p10), 1, %s1098_s20   ;;  %p550_p11 = scmp.eq.s32.totalorder (!%p464_p10), %s1102_s21, 0 }
  0x19   : > { %s1667_s27 = scalar_select %p1173_p9, 1, 0 }
  0x1a   : > { %s1181_s29 = sshll.u32 (!%p464_p10), %s1664_s28, 3  ;;  %s62_s30 = sld [smem:[#allocation5]] (!%p464_p10) }
  0x1b   : > { %s1184_s3 = sld [smem:[#allocation5 + $0x1]] (!%p464_p10)  ;;  %s1105_s4 = smov (!%p464_p10), [#allocation2]  }
  0x1c   : > { %s72_s5 = sshll.u32 (!%p464_p10), %s1105_s4, 4  ;;  %s1106_s6 = smov (!%p464_p10), [#allocation2 + $0x1]   ;;  %s1186_s5 = int_to_ptr.vmem [resolvable:$true] %s72_s5 }
  0x1d   : > { %s87_s7 = sshll.u32 (!%p464_p10), %s1106_s6, 4  ;;  %s1190_s8 = sld [smem:[#allocation5 + $0x2]] (!%p464_p10)  ;;  %s1188_s7 = int_to_ptr.vmem [resolvable:$true] %s87_s7 }
  0x1e   : > { %s1192_s9 = sld [smem:[#allocation5 + $0x3]]  ;;  %s1107_s11 = smov [#allocation2 + $0x2]  }
  0x1f   : > { %s102_s12 = sshll.u32 %s1107_s11, 4  ;;  %s1203_s23 = scalar_lea.hbm %s1661_s1, 8192  ;;  %s1225_s12 = int_to_ptr.vmem [resolvable:$true] %s102_s12 }
  0x20   : > { %s468_s10 = sshll.u32 %s62_s30, 4 }
  0x21   : > { %s64_s15 = scalar_lea.hbm %s1661_s1, %s468_s10  ;;  %s470_s16 = sshll.u32 %s1184_s3, 4 }
  0x22   : > { %s596_s17 = scalar_lea.hbm %s64_s15, 16  ;;  %p601_p1 = scmp.lt.u32.totalorder %s64_s15, %s1661_s1 }
  0x23   : > { %p597_p12 = scmp.ne.s32.totalorder %s64_s15, %s596_s17  ;;  %p602_p2 = scmp.lt.u32.totalorder %s1203_s23, %s596_s17 }
  0x24   : > { %p604_p4 = scmp.lt.u32.totalorder %s596_s17, %s64_s15 }
  0x25   : > { %p598_p13 = pnand %p597_p12, %p550_p11  ;;  %p603_p3 = por %p602_p2, %p601_p1 }
  0x27   : > { %p599_p0 = pneg %p598_p13  ;;  %p605_p5 = por %p604_p4, %p603_p3 }
  0x29   : > { %p606_p6 = pnand %p605_p5, %p599_p0 }
  0x2b   : > { %609 = shalt.err (!%p606_p6)  }
  0x2c   : > { %s610_s30 = scalar_lea.vmem %s1186_s5, 16  ;;  %s1214_s3 = scalar_lea.vmem %s1186_s5, 256 }
  0x2d   : > { %p611_p8 = scmp.ne.s32.totalorder %s1186_s5, %s610_s30  ;;  %p617_p13 = scmp.lt.s32.totalorder %s1186_s5, %s1186_s5 }
  0x2e   : > { %p618_p1 = scmp.lt.s32.totalorder %s1214_s3, %s610_s30 }
  0x2f   : > { %p612_p10 = pnand %p611_p8, %p550_p11 }
  0x30   : > { %p619_p2 = por %p618_p1, %p617_p13 }
  0x31   : > { %p613_p12 = pneg %p612_p10 }
  0x33   : > { %p620_p3 = pnand %p619_p2, %p613_p12 }
  0x35   : > { %623 = shalt.err (!%p620_p3)  }
  0x36   : > { %511 = dma.hbm_to_vmem [thread:$0]  (%p550_p11), %s64_s15, 16, %s1186_s5, [#allocation3] }
  0x37   : > { %s78_s11 = scalar_lea.hbm %s1661_s1, %s470_s16 }
  0x38   : > { %s624_s13 = scalar_lea.hbm %s78_s11, 16  ;;  %p629_p6 = scmp.lt.u32.totalorder %s78_s11, %s1661_s1 }
  0x39   : > { %p625_p0 = scmp.ne.s32.totalorder %s78_s11, %s624_s13  ;;  %p630_p8 = scmp.lt.u32.totalorder %s1203_s23, %s624_s13 }
  0x3a   : > { %p632_p12 = scmp.lt.u32.totalorder %s624_s13, %s78_s11 }
  0x3b   : > { %p626_p4 = pnand %p625_p0, %p550_p11  ;;  %p631_p10 = por %p630_p8, %p629_p6 }
  0x3d   : > { %p627_p5 = pneg %p626_p4  ;;  %p633_p13 = por %p632_p12, %p631_p10 }
  0x3f   : > { %p634_p1 = pnand %p633_p13, %p627_p5 }
  0x41   : > { %637 = shalt.err (!%p634_p1)  }
  0x42   : > { %s638_s15 = scalar_lea.vmem %s1188_s7, 16  ;;  %p645_p4 = scmp.lt.s32.totalorder %s1188_s7, %s1186_s5 }
  0x43   : > { %p639_p2 = scmp.ne.s32.totalorder %s1188_s7, %s638_s15  ;;  %p646_p9 = scmp.lt.s32.totalorder %s1214_s3, %s638_s15 }
  0x45   : > { %p640_p3 = pnand %p639_p2, %p550_p11  ;;  %p647_p7 = por %p646_p9, %p645_p4 }
  0x47   : > { %p641_p0 = pneg %p640_p3 }
  0x49   : > { %p648_p6 = pnand %p647_p7, %p641_p0 }
  0x4b   : > { %651 = shalt.err (!%p648_p6)  }
  0x4c   : > { %512 = dma.hbm_to_vmem [thread:$0]  (%p550_p11), %s78_s11, 16, %s1188_s7, [#allocation3] }
  0x4d   : > { %s472_s16 = sshll.u32 %s1190_s8, 4  ;;  %s474_s18 = sshll.u32 %s1192_s9, 4 }
  0x4e   : > { %s93_s4 = scalar_lea.hbm %s1661_s1, %s472_s16  ;;  %s1251_s10 = scalar_lea.hbm %s1661_s1, %s474_s18 }
  0x4f   : > { %s652_s13 = scalar_lea.hbm %s93_s4, 16  ;;  %p657_p8 = scmp.lt.u32.totalorder %s93_s4, %s1661_s1 }
  0x50   : > { %p653_p7 = scmp.ne.s32.totalorder %s93_s4, %s652_s13  ;;  %p658_p10 = scmp.lt.u32.totalorder %s1203_s23, %s652_s13 }
  0x51   : > { %p660_p13 = scmp.lt.u32.totalorder %s652_s13, %s93_s4 }
  0x52   : > { %p654_p9 = pnand %p653_p7, %p550_p11  ;;  %p659_p12 = por %p658_p10, %p657_p8 }
  0x54   : > { %p655_p5 = pneg %p654_p9  ;;  %p661_p1 = por %p660_p13, %p659_p12 }
  0x56   : > { %p662_p2 = pnand %p661_p1, %p655_p5 }
  0x58   : > { %665 = shalt.err (!%p662_p2)  }
  0x59   : > { %s666_s7 = scalar_lea.vmem %s1225_s12, 16  ;;  %p673_p6 = scmp.lt.s32.totalorder %s1225_s12, %s1186_s5 }
  0x5a   : > { %p667_p3 = scmp.ne.s32.totalorder %s1225_s12, %s666_s7  ;;  %p674_p7 = scmp.lt.s32.totalorder %s1214_s3, %s666_s7 }
  0x5c   : > { %p668_p0 = pnand %p667_p3, %p550_p11  ;;  %p675_p9 = por %p674_p7, %p673_p6 }
  0x5e   : > { %p669_p4 = pneg %p668_p0 }
  0x60   : > { %p676_p8 = pnand %p675_p9, %p669_p4 }
  0x62   : > { %679 = shalt.err (!%p676_p8)  }
  0x63   : > { %513 = dma.hbm_to_vmem [thread:$0]  (%p550_p11), %s93_s4, 16, %s1225_s12, [#allocation3] }
  0x64   : > { %s1269_s8 = sld [smem:[#allocation5 + $0x4]]  ;;  %s1108_s9 = smov [#allocation2 + $0x3]  }
  0x65   : > { %s117_s11 = sshll.u32 %s1108_s9, 4  ;;  %s1109_s15 = smov [#allocation2 + $0x4]   ;;  %s118_s11 = int_to_ptr.vmem [resolvable:$true] %s117_s11 }
  0x66   : > { %s132_s16 = sshll.u32 %s1109_s15, 4  ;;  %s680_s18 = scalar_lea.hbm %s1251_s10, 16  ;;  %s133_s16 = int_to_ptr.vmem [resolvable:$true] %s132_s16 }
  0x67   : > { %p681_p5 = scmp.ne.s32.totalorder %s1251_s10, %s680_s18  ;;  %p685_p13 = scmp.lt.u32.totalorder %s1251_s10, %s1661_s1 }
  0x68   : > { %p686_p1 = scmp.lt.u32.totalorder %s1203_s23, %s680_s18  ;;  %p688_p3 = scmp.lt.u32.totalorder %s680_s18, %s1251_s10 }
  0x69   : > { %p682_p10 = pnand %p681_p5, %p550_p11 }
  0x6a   : > { %p687_p2 = por %p686_p1, %p685_p13 }
  0x6b   : > { %p683_p12 = pneg %p682_p10 }
  0x6c   : > { %p689_p0 = por %p688_p3, %p687_p2 }
  0x6e   : > { %p690_p4 = pnand %p689_p0, %p683_p12 }
  0x70   : > { %693 = shalt.err (!%p690_p4)  }
  0x71   : > { %s694_s12 = scalar_lea.vmem %s118_s11, 16  ;;  %p701_p8 = scmp.lt.s32.totalorder %s118_s11, %s1186_s5 }
  0x72   : > { %p695_p6 = scmp.ne.s32.totalorder %s118_s11, %s694_s12  ;;  %p702_p5 = scmp.lt.s32.totalorder %s1214_s3, %s694_s12 }
  0x74   : > { %p696_p7 = pnand %p695_p6, %p550_p11  ;;  %p703_p10 = por %p702_p5, %p701_p8 }
  0x76   : > { %p697_p9 = pneg %p696_p7 }
  0x78   : > { %p704_p1 = pnand %p703_p10, %p697_p9 }
  0x7a   : > { %707 = shalt.err (!%p704_p1)  }
  0x7b   : > { %514 = dma.hbm_to_vmem [thread:$0]  (%p550_p11), %s1251_s10, 16, %s118_s11, [#allocation3] }
  0x7c   : > { %s1288_s4 = sld [smem:[#allocation5 + $0x5]]  ;;  %s1290_s30 = sld [smem:[#allocation5 + $0x6]] }
  0x7d   : > { %s476_s6 = sshll.u32 %s1269_s8, 4  ;;  %s1110_s13 = smov [#allocation2 + $0x5]  }
  0x7e   : > { %s147_s14 = sshll.u32 %s1110_s13, 4  ;;  %s123_s9 = scalar_lea.hbm %s1661_s1, %s476_s6  ;;  %s1296_s14 = int_to_ptr.vmem [resolvable:$true] %s147_s14 }
  0x7f   : > { %s708_s15 = scalar_lea.hbm %s123_s9, 16  ;;  %p713_p3 = scmp.lt.u32.totalorder %s123_s9, %s1661_s1 }
  0x80   : > { %p709_p12 = scmp.ne.s32.totalorder %s123_s9, %s708_s15  ;;  %p714_p0 = scmp.lt.u32.totalorder %s1203_s23, %s708_s15 }
  0x81   : > { %p716_p6 = scmp.lt.u32.totalorder %s708_s15, %s123_s9 }
  0x82   : > { %p710_p13 = pnand %p709_p12, %p550_p11  ;;  %p715_p4 = por %p714_p0, %p713_p3 }
  0x84   : > { %p711_p2 = pneg %p710_p13  ;;  %p717_p7 = por %p716_p6, %p715_p4 }
  0x86   : > { %p718_p9 = pnand %p717_p7, %p711_p2 }
  0x88   : > { %721 = shalt.err (!%p718_p9)  }
  0x89   : > { %s722_s8 = scalar_lea.vmem %s133_s16, 16  ;;  %p729_p1 = scmp.lt.s32.totalorder %s133_s16, %s1186_s5 }
  0x8a   : > { %p723_p8 = scmp.ne.s32.totalorder %s133_s16, %s722_s8  ;;  %p730_p12 = scmp.lt.s32.totalorder %s1214_s3, %s722_s8 }
  0x8c   : > { %p724_p5 = pnand %p723_p8, %p550_p11  ;;  %p731_p13 = por %p730_p12, %p729_p1 }
  0x8e   : > { %p725_p10 = pneg %p724_p5 }
  0x90   : > { %p732_p0 = pnand %p731_p13, %p725_p10 }
  0x92   : > { %735 = shalt.err (!%p732_p0)  }
  0x93   : > { %515 = dma.hbm_to_vmem [thread:$0]  (%p550_p11), %s123_s9, 16, %s133_s16, [#allocation3] }
  0x94   : > { %s1310_s18 = sld [smem:[#allocation5 + $0x7]]  ;;  %s478_s0 = sshll.u32 %s1288_s4, 4 }
  0x95   : > { %s1111_s24 = smov [#allocation2 + $0x6]   ;;  %s138_s17 = scalar_lea.hbm %s1661_s1, %s478_s0 }
  0x96   : > { %s162_s12 = sshll.u32 %s1111_s24, 4  ;;  %s480_s7 = sshll.u32 %s1290_s30, 4  ;;  %s163_s12 = int_to_ptr.vmem [resolvable:$true] %s162_s12 }
  0x97   : > { %s736_s15 = scalar_lea.hbm %s138_s17, 16  ;;  %p741_p6 = scmp.lt.u32.totalorder %s138_s17, %s1661_s1 }
  0x98   : > { %p737_p2 = scmp.ne.s32.totalorder %s138_s17, %s736_s15  ;;  %p742_p7 = scmp.lt.u32.totalorder %s1203_s23, %s736_s15 }
  0x99   : > { %p744_p8 = scmp.lt.u32.totalorder %s736_s15, %s138_s17 }
  0x9a   : > { %p738_p3 = pnand %p737_p2, %p550_p11  ;;  %p743_p9 = por %p742_p7, %p741_p6 }
  0x9c   : > { %p739_p4 = pneg %p738_p3  ;;  %p745_p5 = por %p744_p8, %p743_p9 }
  0x9e   : > { %p746_p10 = pnand %p745_p5, %p739_p4 }
  0xa0   : > { %749 = shalt.err (!%p746_p10)  }
  0xa1   : > { %s750_s16 = scalar_lea.vmem %s1296_s14, 16  ;;  %p757_p0 = scmp.lt.s32.totalorder %s1296_s14, %s1186_s5 }
  0xa2   : > { %p751_p1 = scmp.ne.s32.totalorder %s1296_s14, %s750_s16  ;;  %p758_p2 = scmp.lt.s32.totalorder %s1214_s3, %s750_s16 }
  0xa4   : > { %p752_p12 = pnand %p751_p1, %p550_p11  ;;  %p759_p3 = por %p758_p2, %p757_p0 }
  0xa6   : > { %p753_p13 = pneg %p752_p12 }
  0xa8   : > { %p760_p6 = pnand %p759_p3, %p753_p13 }
  0xaa   : > { %763 = shalt.err (!%p760_p6)  }
  0xab   : > { %516 = dma.hbm_to_vmem [thread:$0]  (%p550_p11), %s138_s17, 16, %s1296_s14, [#allocation3] }
  0xac   : > { %s153_s9 = scalar_lea.hbm %s1661_s1, %s480_s7 }
  0xad   : > { %s764_s8 = scalar_lea.hbm %s153_s9, 16  ;;  %p769_p8 = scmp.lt.u32.totalorder %s153_s9, %s1661_s1 }
  0xae   : > { %p765_p4 = scmp.ne.s32.totalorder %s153_s9, %s764_s8  ;;  %p770_p5 = scmp.lt.u32.totalorder %s1203_s23, %s764_s8 }
  0xaf   : > { %p772_p1 = scmp.lt.u32.totalorder %s764_s8, %s153_s9 }
  0xb0   : > { %p766_p7 = pnand %p765_p4, %p550_p11  ;;  %p771_p10 = por %p770_p5, %p769_p8 }
  0xb2   : > { %p767_p9 = pneg %p766_p7  ;;  %p773_p12 = por %p772_p1, %p771_p10 }
  0xb4   : > { %p774_p13 = pnand %p773_p12, %p767_p9 }
  0xb6   : > { %777 = shalt.err (!%p774_p13)  }
  0xb7   : > { %s778_s14 = scalar_lea.vmem %s163_s12, 16  ;;  %p785_p6 = scmp.lt.s32.totalorder %s163_s12, %s1186_s5 }
  0xb8   : > { %p779_p0 = scmp.ne.s32.totalorder %s163_s12, %s778_s14  ;;  %p786_p4 = scmp.lt.s32.totalorder %s1214_s3, %s778_s14 }
  0xba   : > { %p780_p2 = pnand %p779_p0, %p550_p11  ;;  %p787_p7 = por %p786_p4, %p785_p6 }
  0xbc   : > { %p781_p3 = pneg %p780_p2 }
  0xbe   : > { %p788_p5 = pnand %p787_p7, %p781_p3 }
  0xc0   : > { %791 = shalt.err (!%p788_p5)  }
  0xc1   : > { %517 = dma.hbm_to_vmem [thread:$0]  (%p550_p11), %s153_s9, 16, %s163_s12, [#allocation3] }
  0xc2   : > { %s482_s6 = sshll.u32 %s1310_s18, 4  ;;  %s1112_s15 = smov [#allocation2 + $0x7]  }
  0xc3   : > { %s168_s7 = scalar_lea.hbm %s1661_s1, %s482_s6  ;;  %s177_s10 = sshll.u32 %s1112_s15, 4  ;;  %s178_s10 = int_to_ptr.vmem [resolvable:$true] %s177_s10 }
  0xc4   : > { %s792_s11 = scalar_lea.hbm %s168_s7, 16  ;;  %p797_p12 = scmp.lt.u32.totalorder %s168_s7, %s1661_s1 }
  0xc5   : > { %p793_p8 = scmp.ne.s32.totalorder %s168_s7, %s792_s11  ;;  %p798_p13 = scmp.lt.u32.totalorder %s1203_s23, %s792_s11 }
  0xc6   : > { %p800_p2 = scmp.lt.u32.totalorder %s792_s11, %s168_s7 }
  0xc7   : > { %p794_p10 = pnand %p793_p8, %p550_p11  ;;  %p799_p0 = por %p798_p13, %p797_p12 }
  0xc9   : > { %p795_p1 = pneg %p794_p10  ;;  %p801_p3 = por %p800_p2, %p799_p0 }
  0xcb   : > { %p802_p6 = pnand %p801_p3, %p795_p1 }
  0xcd   : > { %805 = shalt.err (!%p802_p6)  }
  0xce   : > { %s806_s18 = scalar_lea.vmem %s178_s10, 16  ;;  %p813_p8 = scmp.lt.s32.totalorder %s178_s10, %s1186_s5 }
  0xcf   : > { %p807_p4 = scmp.ne.s32.totalorder %s178_s10, %s806_s18  ;;  %p814_p10 = scmp.lt.s32.totalorder %s1214_s3, %s806_s18 }
  0xd1   : > { %p808_p7 = pnand %p807_p4, %p550_p11  ;;  %p815_p9 = por %p814_p10, %p813_p8 }
  0xd3   : > { %p809_p5 = pneg %p808_p7 }
  0xd5   : > { %p816_p12 = pnand %p815_p9, %p809_p5 }
  0xd7   : > { %819 = shalt.err (!%p816_p12)  }
  0xd8   : > { %518 = dma.hbm_to_vmem [thread:$0]  (%p550_p11), %s168_s7, 16, %s178_s10, [#allocation3] }
  0xd9   : > { %s53_s12 = ssub.s32 0, %s1102_s21  ;;  %p551_p1 = scmp.lt.s32.totalorder %s1158_s22, 2 }
  0xda   : > { %s466_s30 = smin.u32 %s1102_s21, %s53_s12  ;;  %s508_s8 = sshll.u32 %s1102_s21, 3 }
  0xdb   : > { %s55_s9 = sand.u32 1, %s466_s30   ;;  %s1369_s24 = sadd.s32 8, %s508_s8 }
  0xdc   : > { %s56_s0 = ssub.s32 0, %s55_s9  ;;  %p1668_p9 = scmp.lt.s32.totalorder %s1102_s21, 0 }
  0xdd   : > { %s520_s14 = scalar_select %p551_p1, [#allocation5], [#allocation42] }
  0xde   : > { %s1678_s0 = smov (!%p1668_p9, %s56_s0), %s55_s9  ;;  %s205_s16 = sadd.s32 1, %s1369_s24 }
  0xdf   : > { %s186_s6 = ssub.s32 1, %s1678_s0  ;;  %s1680_s16 = smov (!%p551_p1, %s205_s16), 0 }
  0xe0   : > { %s521_s17 = scalar_select %p551_p1, %s1369_s24, 0 }
  0xe1   : > { %s486_s7 = sshll.u32 %s186_s6, 3 }
  0xe2   : > { %s188_s15 = sld [smem:[%s520_s14 + %s521_s17]]  ;;  %s1382_s10 = scalar_lea.vmem [#allocation2], %s486_s7 }
  0xe3   : > { %s201_s11 = sshll.u32 %s1382_s10, 4  ;;  %s409_s4 = scalar_lea.vmem %s1382_s10, 1 [#allocation2]  ;;  %s1385_s11 = int_to_ptr.vmem [resolvable:$true] %s201_s11 }
  0xe4   : > { %s523_s18 = scalar_select %p551_p1, [#allocation5], [#allocation43] }
  0xe5   : > { %s218_s30 = sshll.u32 %s409_s4, 4  ;;  %s1398_s7 = scalar_lea.sflag [#allocation3], %s186_s6  ;;  %s1417_s30 = int_to_ptr.vmem [resolvable:$true] %s218_s30 }
  0xe6   : > { %s1396_s17 = sld [smem:[%s523_s18 + %s1680_s16]] }
  0xe8   : > { %s485_s12 = sshll.u32 %s188_s15, 4 }
  0xe9   : > { %s190_s14 = scalar_lea.hbm %s1661_s1, %s485_s12 }
  0xea   : > { %s820_s28 = scalar_lea.hbm %s190_s14, 16  ;;  %p825_p2 = scmp.lt.u32.totalorder %s190_s14, %s1661_s1 }
  0xeb   : > { %p821_p11 = scmp.ne.s32.totalorder %s190_s14, %s820_s28  ;;  %p826_p3 = scmp.lt.u32.totalorder %s1203_s23, %s820_s28 }
  0xec   : > { %p828_p4 = scmp.lt.u32.totalorder %s820_s28, %s190_s14 }
  0xed   : > { %p822_p13 = pnand %p821_p11, %p551_p1  ;;  %p827_p6 = por %p826_p3, %p825_p2 }
  0xef   : > { %p823_p0 = pneg %p822_p13  ;;  %p829_p7 = por %p828_p4, %p827_p6 }
  0xf1   : > { %p830_p5 = pnand %p829_p7, %p823_p0 }
  0xf3   : > { %833 = shalt.err (!%p830_p5)  }
  0xf4   : > { %s834_s6 = scalar_lea.vmem %s1385_s11, 16  ;;  %p841_p9 = scmp.lt.s32.totalorder %s1385_s11, %s1186_s5 }
  0xf5   : > { %p835_p8 = scmp.ne.s32.totalorder %s1385_s11, %s834_s6  ;;  %p842_p11 = scmp.lt.s32.totalorder %s1214_s3, %s834_s6 }
  0xf7   : > { %p836_p10 = pnand %p835_p8, %p551_p1  ;;  %p843_p13 = por %p842_p11, %p841_p9 }
  0xf9   : > { %p837_p12 = pneg %p836_p10 }
  0xfb   : > { %p844_p2 = pnand %p843_p13, %p837_p12 }
  0xfd   : > { %847 = shalt.err (!%p844_p2)  }
  0xfe   : > { %522 = dma.hbm_to_vmem [thread:$0]  (%p551_p1), %s190_s14, 16, %s1385_s11, %s1398_s7 }
  0xff   : > { %s222_s25 = sadd.s32 2, %s1369_s24  ;;  %s414_s13 = scalar_lea.vmem %s1382_s10, 2 [#allocation2] }
 0x100   : > { %s526_s28 = scalar_select %p551_p1, [#allocation5], [#allocation44] }
 0x101   : > { %s1682_s25 = smov (!%p551_p1, %s222_s25), 0  ;;  %s239_s15 = sadd.s32 3, %s1369_s24 }
 0x102   : > { %s487_s16 = sshll.u32 %s1396_s17, 4  ;;  %s1427_s4 = sld [smem:[%s526_s28 + %s1682_s25]] }
 0x103   : > { %s208_s9 = scalar_lea.hbm %s1661_s1, %s487_s16  ;;  %s235_s8 = sshll.u32 %s414_s13, 4  ;;  %s1449_s8 = int_to_ptr.vmem [resolvable:$true] %s235_s8 }
 0x104   : > { %s848_s6 = scalar_lea.hbm %s208_s9, 16  ;;  %p853_p4 = scmp.lt.u32.totalorder %s208_s9, %s1661_s1 }
 0x105   : > { %p849_p0 = scmp.ne.s32.totalorder %s208_s9, %s848_s6  ;;  %p854_p7 = scmp.lt.u32.totalorder %s1203_s23, %s848_s6 }
 0x106   : > { %p856_p8 = scmp.lt.u32.totalorder %s848_s6, %s208_s9 }
 0x107   : > { %p850_p3 = pnand %p849_p0, %p551_p1  ;;  %p855_p5 = por %p854_p7, %p853_p4 }
 0x109   : > { %p851_p6 = pneg %p850_p3  ;;  %p857_p10 = por %p856_p8, %p855_p5 }
 0x10b   : > { %p858_p12 = pnand %p857_p10, %p851_p6 }
 0x10d   : > { %861 = shalt.err (!%p858_p12)  }
 0x10e   : > { %s862_s17 = scalar_lea.vmem %s1417_s30, 16  ;;  %p869_p2 = scmp.lt.s32.totalorder %s1417_s30, %s1186_s5 }
 0x10f   : > { %p863_p9 = scmp.ne.s32.totalorder %s1417_s30, %s862_s17  ;;  %p870_p0 = scmp.lt.s32.totalorder %s1214_s3, %s862_s17 }
 0x111   : > { %p864_p11 = pnand %p863_p9, %p551_p1  ;;  %p871_p3 = por %p870_p0, %p869_p2 }
 0x113   : > { %p865_p13 = pneg %p864_p11 }
 0x115   : > { %p872_p4 = pnand %p871_p3, %p865_p13 }
 0x117   : > { %875 = shalt.err (!%p872_p4)  }
 0x118   : > { %525 = dma.hbm_to_vmem [thread:$0]  (%p551_p1), %s208_s9, 16, %s1417_s30, %s1398_s7 }
 0x119   : > { %s419_s25 = scalar_lea.vmem %s1382_s10, 3 [#allocation2]  ;;  %s1684_s15 = smov (!%p551_p1, %s239_s15), 0 }
 0x11a   : > { %s529_s28 = scalar_select %p551_p1, [#allocation5], [#allocation45] }
 0x11b   : > { %s489_s13 = sshll.u32 %s1427_s4, 4  ;;  %s252_s16 = sshll.u32 %s419_s25, 4  ;;  %s1479_s16 = int_to_ptr.vmem [resolvable:$true] %s252_s16 }
 0x11c   : > { %s225_s6 = scalar_lea.hbm %s1661_s1, %s489_s13  ;;  %s1460_s11 = sld [smem:[%s529_s28 + %s1684_s15]] }
 0x11d   : > { %s876_s14 = scalar_lea.hbm %s225_s6, 16  ;;  %p881_p8 = scmp.lt.u32.totalorder %s225_s6, %s1661_s1 }
 0x11e   : > { %p877_p6 = scmp.ne.s32.totalorder %s225_s6, %s876_s14  ;;  %p882_p10 = scmp.lt.u32.totalorder %s1203_s23, %s876_s14 }
 0x11f   : > { %p884_p9 = scmp.lt.u32.totalorder %s876_s14, %s225_s6 }
 0x120   : > { %p878_p7 = pnand %p877_p6, %p551_p1  ;;  %p883_p12 = por %p882_p10, %p881_p8 }
 0x122   : > { %p879_p5 = pneg %p878_p7  ;;  %p885_p11 = por %p884_p9, %p883_p12 }
 0x124   : > { %p886_p13 = pnand %p885_p11, %p879_p5 }
 0x126   : > { %889 = shalt.err (!%p886_p13)  }
 0x127   : > { %s890_s15 = scalar_lea.vmem %s1449_s8, 16  ;;  %p897_p4 = scmp.lt.s32.totalorder %s1449_s8, %s1186_s5 }
 0x128   : > { %p891_p2 = scmp.ne.s32.totalorder %s1449_s8, %s890_s15  ;;  %p898_p6 = scmp.lt.s32.totalorder %s1214_s3, %s890_s15 }
 0x12a   : > { %p892_p0 = pnand %p891_p2, %p551_p1  ;;  %p899_p7 = por %p898_p6, %p897_p4 }
 0x12c   : > { %p893_p3 = pneg %p892_p0 }
 0x12e   : > { %p900_p8 = pnand %p899_p7, %p893_p3 }
 0x130   : > { %903 = shalt.err (!%p900_p8)  }
 0x131   : > { %528 = dma.hbm_to_vmem [thread:$0]  (%p551_p1), %s225_s6, 16, %s1449_s8, %s1398_s7 }
 0x132   : > { %s256_s4 = sadd.s32 4, %s1369_s24  ;;  %s424_s25 = scalar_lea.vmem %s1382_s10, 4 [#allocation2] }
 0x133   : > { %s532_s17 = scalar_select %p551_p1, [#allocation5], [#allocation46] }
 0x134   : > { %s1686_s4 = smov (!%p551_p1, %s256_s4), 0  ;;  %s273_s28 = sadd.s32 5, %s1369_s24 }
 0x135   : > { %s491_s13 = sshll.u32 %s1460_s11, 4  ;;  %s1489_s18 = sld [smem:[%s532_s17 + %s1686_s4]] }
 0x136   : > { %s242_s30 = scalar_lea.hbm %s1661_s1, %s491_s13  ;;  %s269_s9 = sshll.u32 %s424_s25, 4  ;;  %s1511_s9 = int_to_ptr.vmem [resolvable:$true] %s269_s9 }
 0x137   : > { %s904_s15 = scalar_lea.hbm %s242_s30, 16  ;;  %p909_p9 = scmp.lt.u32.totalorder %s242_s30, %s1661_s1 }
 0x138   : > { %p905_p5 = scmp.ne.s32.totalorder %s242_s30, %s904_s15  ;;  %p910_p11 = scmp.lt.u32.totalorder %s1203_s23, %s904_s15 }
 0x139   : > { %p912_p2 = scmp.lt.u32.totalorder %s904_s15, %s242_s30 }
 0x13a   : > { %p906_p10 = pnand %p905_p5, %p551_p1  ;;  %p911_p13 = por %p910_p11, %p909_p9 }
 0x13c   : > { %p907_p12 = pneg %p906_p10  ;;  %p913_p0 = por %p912_p2, %p911_p13 }
 0x13e   : > { %p914_p3 = pnand %p913_p0, %p907_p12 }
 0x140   : > { %917 = shalt.err (!%p914_p3)  }
 0x141   : > { %s918_s11 = scalar_lea.vmem %s1479_s16, 16  ;;  %p925_p8 = scmp.lt.s32.totalorder %s1479_s16, %s1186_s5 }
 0x142   : > { %p919_p4 = scmp.ne.s32.totalorder %s1479_s16, %s918_s11  ;;  %p926_p5 = scmp.lt.s32.totalorder %s1214_s3, %s918_s11 }
 0x144   : > { %p920_p6 = pnand %p919_p4, %p551_p1  ;;  %p927_p10 = por %p926_p5, %p925_p8 }
 0x146   : > { %p921_p7 = pneg %p920_p6 }
 0x148   : > { %p928_p9 = pnand %p927_p10, %p921_p7 }
 0x14a   : > { %931 = shalt.err (!%p928_p9)  }
 0x14b   : > { %531 = dma.hbm_to_vmem [thread:$0]  (%p551_p1), %s242_s30, 16, %s1479_s16, %s1398_s7 }
 0x14c   : > { %s429_s4 = scalar_lea.vmem %s1382_s10, 5 [#allocation2]  ;;  %s1688_s28 = smov (!%p551_p1, %s273_s28), 0 }
 0x14d   : > { %s535_s17 = scalar_select %p551_p1, [#allocation5], [#allocation47] }
 0x14e   : > { %s493_s25 = sshll.u32 %s1489_s18, 4  ;;  %s286_s13 = sshll.u32 %s429_s4, 4  ;;  %s1541_s13 = int_to_ptr.vmem [resolvable:$true] %s286_s13 }
 0x14f   : > { %s259_s15 = scalar_lea.hbm %s1661_s1, %s493_s25  ;;  %s1522_s8 = sld [smem:[%s535_s17 + %s1688_s28]] }
 0x150   : > { %s932_s6 = scalar_lea.hbm %s259_s15, 16  ;;  %p937_p2 = scmp.lt.u32.totalorder %s259_s15, %s1661_s1 }
 0x151   : > { %p933_p12 = scmp.ne.s32.totalorder %s259_s15, %s932_s6  ;;  %p938_p0 = scmp.lt.u32.totalorder %s1203_s23, %s932_s6 }
 0x152   : > { %p940_p4 = scmp.lt.u32.totalorder %s932_s6, %s259_s15 }
 0x153   : > { %p934_p11 = pnand %p933_p12, %p551_p1  ;;  %p939_p3 = por %p938_p0, %p937_p2 }
 0x155   : > { %p935_p13 = pneg %p934_p11  ;;  %p941_p6 = por %p940_p4, %p939_p3 }
 0x157   : > { %p942_p7 = pnand %p941_p6, %p935_p13 }
 0x159   : > { %945 = shalt.err (!%p942_p7)  }
 0x15a   : > { %s946_s28 = scalar_lea.vmem %s1511_s9, 16  ;;  %p953_p9 = scmp.lt.s32.totalorder %s1511_s9, %s1186_s5 }
 0x15b   : > { %p947_p8 = scmp.ne.s32.totalorder %s1511_s9, %s946_s28  ;;  %p954_p12 = scmp.lt.s32.totalorder %s1214_s3, %s946_s28 }
 0x15d   : > { %p948_p5 = pnand %p947_p8, %p551_p1  ;;  %p955_p11 = por %p954_p12, %p953_p9 }
 0x15f   : > { %p949_p10 = pneg %p948_p5 }
 0x161   : > { %p956_p0 = pnand %p955_p11, %p949_p10 }
 0x163   : > { %959 = shalt.err (!%p956_p0)  }
 0x164   : > { %534 = dma.hbm_to_vmem [thread:$0]  (%p551_p1), %s259_s15, 16, %s1511_s9, %s1398_s7 }
 0x165   : > { %s290_s18 = sadd.s32 6, %s1369_s24  ;;  %s434_s4 = scalar_lea.vmem %s1382_s10, 6 [#allocation2] }
 0x166   : > { %s538_s11 = scalar_select %p551_p1, [#allocation5], [#allocation48] }
 0x167   : > { %s1690_s18 = smov (!%p551_p1, %s290_s18), 0  ;;  %s307_s17 = sadd.s32 7, %s1369_s24 }
 0x168   : > { %s495_s25 = sshll.u32 %s1522_s8, 4  ;;  %s1551_s12 = sld [smem:[%s538_s11 + %s1690_s18]] }
 0x169   : > { %s276_s16 = scalar_lea.hbm %s1661_s1, %s495_s25  ;;  %s303_s30 = sshll.u32 %s434_s4, 4  ;;  %s304_s30 = int_to_ptr.vmem [resolvable:$true] %s303_s30 }
 0x16a   : > { %s960_s28 = scalar_lea.hbm %s276_s16, 16  ;;  %p965_p4 = scmp.lt.u32.totalorder %s276_s16, %s1661_s1 }
 0x16b   : > { %p961_p13 = scmp.ne.s32.totalorder %s276_s16, %s960_s28  ;;  %p966_p6 = scmp.lt.u32.totalorder %s1203_s23, %s960_s28 }
 0x16c   : > { %p968_p8 = scmp.lt.u32.totalorder %s960_s28, %s276_s16 }
 0x16d   : > { %p962_p2 = pnand %p961_p13, %p551_p1  ;;  %p967_p7 = por %p966_p6, %p965_p4 }
 0x16f   : > { %p963_p3 = pneg %p962_p2  ;;  %p969_p5 = por %p968_p8, %p967_p7 }
 0x171   : > { %p970_p10 = pnand %p969_p5, %p963_p3 }
 0x173   : > { %973 = shalt.err (!%p970_p10)  }
 0x174   : > { %s974_s24 = scalar_lea.vmem %s1541_s13, 16  ;;  %p981_p0 = scmp.lt.s32.totalorder %s1541_s13, %s1186_s5 }
 0x175   : > { %p975_p9 = scmp.ne.s32.totalorder %s1541_s13, %s974_s24  ;;  %p982_p13 = scmp.lt.s32.totalorder %s1214_s3, %s974_s24 }
 0x177   : > { %p976_p12 = pnand %p975_p9, %p551_p1  ;;  %p983_p2 = por %p982_p13, %p981_p0 }
 0x179   : > { %p977_p11 = pneg %p976_p12 }
 0x17b   : > { %p984_p4 = pnand %p983_p2, %p977_p11 }
 0x17d   : > { %987 = shalt.err (!%p984_p4)  }
 0x17e   : > { %537 = dma.hbm_to_vmem [thread:$0]  (%p551_p1), %s276_s16, 16, %s1541_s13, %s1398_s7 }
 0x17f   : > { %s541_s8 = scalar_select %p551_p1, [#allocation5], [#allocation49] }
 0x180   : > { %s1692_s17 = smov (!%p551_p1, %s307_s17), 0  ;;  %s497_s18 = sshll.u32 %s1551_s12, 4 }
 0x181   : > { %s439_s11 = scalar_lea.vmem %s1382_s10, 7 [#allocation2]  ;;  %s293_s14 = scalar_lea.hbm %s1661_s1, %s497_s18 }
 0x182   : > { %s308_s6 = sld [smem:[%s541_s8 + %s1692_s17]]  ;;  %s988_s28 = scalar_lea.hbm %s293_s14, 16 }
 0x183   : > { %p989_p3 = scmp.ne.s32.totalorder %s293_s14, %s988_s28  ;;  %p993_p8 = scmp.lt.u32.totalorder %s293_s14, %s1661_s1 }
 0x184   : > { %p994_p5 = scmp.lt.u32.totalorder %s1203_s23, %s988_s28  ;;  %p996_p9 = scmp.lt.u32.totalorder %s988_s28, %s293_s14 }
 0x185   : > { %p990_p6 = pnand %p989_p3, %p551_p1 }
 0x186   : > { %p995_p10 = por %p994_p5, %p993_p8 }
 0x187   : > { %p991_p7 = pneg %p990_p6 }
 0x188   : > { %p997_p12 = por %p996_p9, %p995_p10 }
 0x18a   : > { %p998_p11 = pnand %p997_p12, %p991_p7 }
 0x18c   : > { %1001 = shalt.err (!%p998_p11)  }
 0x18d   : > { %s1002_s10 = scalar_lea.vmem %s304_s30, 16  ;;  %p1009_p4 = scmp.lt.s32.totalorder %s304_s30, %s1186_s5 }
 0x18e   : > { %p1003_p0 = scmp.ne.s32.totalorder %s304_s30, %s1002_s10  ;;  %p1010_p3 = scmp.lt.s32.totalorder %s1214_s3, %s1002_s10 }
 0x190   : > { %p1004_p13 = pnand %p1003_p0, %p551_p1  ;;  %p1011_p6 = por %p1010_p3, %p1009_p4 }
 0x192   : > { %p1005_p2 = pneg %p1004_p13 }
 0x194   : > { %p1012_p5 = pnand %p1011_p6, %p1005_p2 }
 0x196   : > { %1015 = shalt.err (!%p1012_p5)  }
 0x197   : > { %540 = dma.hbm_to_vmem [thread:$0]  (%p551_p1), %s293_s14, 16, %s304_s30, %s1398_s7 }
 0x198   : > { %s320_s13 = sshll.u32 %s439_s11, 4  ;;  %s499_s17 = sshll.u32 %s308_s6, 4  ;;  %s321_s13 = int_to_ptr.vmem [resolvable:$true] %s320_s13 }
 0x199   : > { %s310_s24 = scalar_lea.hbm %s1661_s1, %s499_s17 }
 0x19a   : > { %s1016_s8 = scalar_lea.hbm %s310_s24, 16  ;;  %p1021_p9 = scmp.lt.u32.totalorder %s310_s24, %s1661_s1 }
 0x19b   : > { %p1017_p7 = scmp.ne.s32.totalorder %s310_s24, %s1016_s8  ;;  %p1022_p12 = scmp.lt.u32.totalorder %s1203_s23, %s1016_s8 }
 0x19c   : > { %p1024_p0 = scmp.lt.u32.totalorder %s1016_s8, %s310_s24 }
 0x19d   : > { %p1018_p8 = pnand %p1017_p7, %p551_p1  ;;  %p1023_p11 = por %p1022_p12, %p1021_p9 }
 0x19f   : > { %p1019_p10 = pneg %p1018_p8  ;;  %p1025_p13 = por %p1024_p0, %p1023_p11 }
 0x1a1   : > { %p1026_p2 = pnand %p1025_p13, %p1019_p10 }
 0x1a3   : > { %1029 = shalt.err (!%p1026_p2)  }
 0x1a4   : > { %s1030_s30 = scalar_lea.vmem %s321_s13, 16  ;;  %p1037_p5 = scmp.lt.s32.totalorder %s321_s13, %s1186_s5 }
 0x1a5   : > { %p1031_p4 = scmp.ne.s32.totalorder %s321_s13, %s1030_s30  ;;  %p1038_p7 = scmp.lt.s32.totalorder %s1214_s3, %s1030_s30 }
 0x1a7   : > { %p1032_p3 = pnand %p1031_p4, %p551_p1  ;;  %p1039_p8 = por %p1038_p7, %p1037_p5 }
 0x1a9   : > { %p1033_p6 = pneg %p1032_p3 }
 0x1ab   : > { %p1040_p9 = pnand %p1039_p8, %p1033_p6 }
 0x1ad   : > { %1043 = shalt.err (!%p1040_p9)  }
 0x1ae   : > { %543 = dma.hbm_to_vmem [thread:$0]  (%p551_p1), %s310_s24, 16, %s321_s13, %s1398_s7 }
 0x1af   : > { %s51_s23 = scalar_lea.vmem [#allocation6], %s1181_s29  ;;  %s1669_s11 = sshll.u32 %s1678_s0, 3 }
 0x1b0   : > { %s325_s25 = scalar_lea.vmem [#allocation2], %s1669_s11  ;;  %s326_s14 = scalar_lea.sflag [#allocation3], %s1678_s0 }
 0x1b1   : > { %1086 = dma.done.wait %s326_s14, 128 }
 0x1b2   : > { %1087 = vsyncadd %s326_s14, 4294967168  ;;  %s503_s5 = sshll.u32 %s1102_s21, 7  ;;  %s347_s3 = sshll.u32 %s51_s23, 4  ;;  %v330_v0 = vld [vmem:[%s325_s25] sm:$0xff]  ;;  %s1621_s3 = int_to_ptr.vmem [resolvable:$true] %s347_s3 }
 0x1b3   : > { %v331_v1 = vmul.f32 11.313708, %v330_v0  ;;  %s1619_s9 = scalar_lea.hbm %s1662_s2, %s503_s5  ;;  %s1670_s29 = sand.u32 1, %s1098_s20  }
 0x1b4   : > { %s334_s0 = scalar_lea.sflag [#allocation7], %s1670_s29  ;;  %s1044_s7 = scalar_lea.vmem %s1621_s3, 128 }
 0x1b5   : > { %332 = vst [vmem:[%s51_s23] sm:$0xff] %v331_v1  ;;  %p1045_p1 = scmp.ne.s32.totalorder %s1621_s3, %s1044_s7  ;;  %p1671_p10 = scmp.ne.s32.totalorder %s1666_s26, 0 }
 0x1b6   : > { %s1113_s15 = smov [#allocation6]  }
 0x1b7   : > { %p1046_p12 = pnand %p1045_p1, %p1671_p10  ;;  %s1048_s10 = sshll.u32 %s1113_s15, 4  ;;  %s1049_s10 = int_to_ptr.vmem [resolvable:$false] %s1048_s10 }
 0x1b8   : > { %s1050_s13 = scalar_lea.vmem %s1049_s10, 256  ;;  %p1051_p0 = scmp.lt.s32.totalorder %s1621_s3, %s1049_s10 }
 0x1b9   : > { %p1047_p11 = pneg %p1046_p12  ;;  %p1052_p13 = scmp.lt.s32.totalorder %s1050_s13, %s1044_s7 }
 0x1bb   : > { %p1053_p2 = por %p1052_p13, %p1051_p0 }
 0x1bd   : > { %p1054_p4 = pnand %p1053_p2, %p1047_p11 }
 0x1bf   : > { %1057 = shalt.err (!%p1054_p4)
}
 0x1c0   : > { %s1058_s17 = scalar_lea.hbm %s1619_s9, 128  ;;  %s1062_s24 = scalar_lea.hbm %s1662_s2, 256 }
 0x1c1   : > { %p1059_p3 = scmp.ne.s32.totalorder %s1619_s9, %s1058_s17  ;;  %p1063_p7 = scmp.lt.u32.totalorder %s1619_s9, %s1662_s2 }
 0x1c2   : > { %p1064_p8 = scmp.lt.u32.totalorder %s1062_s24, %s1058_s17  ;;  %p1066_p1 = scmp.lt.u32.totalorder %s1058_s17, %s1619_s9 }
 0x1c3   : > { %p1060_p6 = pnand %p1059_p3, %p1671_p10 }
 0x1c4   : > { %p1065_p9 = por %p1064_p8, %p1063_p7 }
 0x1c5   : > { %p1061_p5 = pneg %p1060_p6 }
 0x1c6   : > { %p1067_p12 = por %p1066_p1, %p1065_p9 }
 0x1c8   : > { %p1068_p11 = pnand %p1067_p12, %p1061_p5 }
 0x1ca   : > { %1071 = shalt.err (!%p1068_p11)
}
 0x1cb   : > { %544 = dma.vmem_to_hbm [thread:$0]  (%p1671_p10), %s1621_s3, 128, %s1619_s9, %s334_s0  }
 0x1cc PF: > { %p552_p0 = scmp.ge.s32.totalorder %s1102_s21, 1  ;;  %s359_s4 = sand.u32 1, %s1094_s19  }
 0x1cd   : > { %p1672_p13 = scmp.ne.s32.totalorder %s1667_s27, 0  ;;  %s360_s30 = scalar_lea.sflag [#allocation7], %s359_s4 }
 0x1cf   : > { %p547_p2 = pnand %p552_p0, %p1672_p13 }
 0x1d1   : > { %1089 = dma.done.wait (!%p547_p2), %s360_s30, 128  }
 0x1d2   : > { %1091 = vsyncadd (!%p547_p2), %s360_s30, 4294967168  ;;  %s1673_s23 = sld [smem:[#allocation53_spill]]  ;;  %p16_p4 = scmp.ge.s32.totalorder %s1158_s22, 3  }
 0x1d3   : > { %s1674_s19 = smov %s1098_s20  ;;  %s1676_s21 = smov %s1158_s22 }
 0x1d4   :  { %18 = sbr.rel (!%p16_p4) target bundleno = 15 (0xf), region = 151 }
 0x1d8   : > { %s1675_s20 = smov %s1673_s23 }
 0x1db   :  { %365 = vsyncpa [#allocation7], 1 }
 0x1dc   :  { %367 = vsyncpa [#allocation7 + $0x1], 1 }
 0x1dd   :  { %368 = vsyncmov [#allocation3] }
 0x1e0   :  { %s369_s21 = vpop.sfrf %368 }
 0x1e1   :  { %p506_p10 = scmp.ne.s32.totalorder %s369_s21, 0 }
 0x1e3   :  { %373 = shalt.err (%p506_p10)  }
 0x1e4   :  { %375 = vsyncmov [#allocation3 + $0x1] }
 0x1e7   :  { %s376_s26 = vpop.sfrf %375 }
 0x1e8   :  { %p507_p3 = scmp.ne.s32.totalorder %s376_s26, 0 }
 0x1ea   :  { %380 = shalt.err (%p507_p3)  }

</bundles_post_ra>
